<compile_context>
chip_gen: v7x
topology: tpu7x:2x2x1
jax: 0.10.0
libtpu: 0.0.40
codegen_flags: <defaults>
</compile_context>

<pallas_src>
import functools

import jax
import jax.numpy as jnp
from jax.experimental import pallas as pl
from jax.experimental.pallas import tpu as pltpu

EPS = 1e-5
MAX_ROW_TILE = 1024          # absolute upper bound on rows per block (sweepable)
TARGET_STEPS = 8             # aim for >= this many grid steps when rows allow
MIN_PALLAS_ELEMS = 1 << 18   # below this, XLA-fused LayerNorm beats any pallas_call
_F32_TEMP_BYTES = 12         # x32 + centered/normalized f32 temps live across a block


def _cdiv(a, b):
    return -(-a // b)


def _round_up(a, b):
    return _cdiv(a, b) * b


def _vmem_budgets():
    """Return (block_budget_bytes, scoped_vmem_limit_bytes), generation-aware."""
    vmem_cap = 64 * 1024 * 1024  # conservative default == v7x (64 MiB per TC)
    try:
        info = pltpu.get_tpu_info()
        vmem_cap = int(getattr(info, "vmem_capacity_bytes", vmem_cap))
    except Exception:
        pass
    if vmem_cap >= 96 * 1024 * 1024:
        # v5e / v6e: 128 MiB physical VMEM -> big tiles, few DMAs (mem-bound).
        return 48 * 1024 * 1024, 64 * 1024 * 1024
    # v7x: 64 MiB physical, 32 MiB scoped default -> leave headroom.
    return 20 * 1024 * 1024, 32 * 1024 * 1024


def _layernorm_kernel(x_ref, w_ref, b_ref, o_ref, *, inv_size):
    # x_ref: (ROW_TILE, size); w_ref / b_ref: (1, size), already float32.
    x = x_ref[...].astype(jnp.float32)
    # Fused single traversal: sum(x) and sum(x*x) in one pass over the block
    # (instead of a mean pass followed by a centered pass); f32 accumulation.
    s1 = jnp.sum(x, axis=-1, keepdims=True)
    s2 = jnp.sum(x * x, axis=-1, keepdims=True)
    mean = s1 * inv_size
    # E[x^2] - mean^2 can cancel slightly negative; clamp at 0.
    # TODO(synk): subtract a per-row shift before accumulating if activations
    # can sit far from zero (cancellation risk of the single-pass variance).
    var = jnp.maximum(s2 * inv_size - mean * mean, 0.0)
    y = (x - mean) * jax.lax.rsqrt(var + EPS) * w_ref[...] + b_ref[...]
    o_ref[...] = y.astype(o_ref.dtype)


def _pick_row_tile(rows, size, itemsize, block_budget):
    """Pick a sublane-aligned row tile that fits the VMEM budget and yields a
    well-shaped grid (>= TARGET_STEPS steps, even count when possible)."""
    # Sublane packing multiple: 8 for f32, 16 for bf16, 32 for int8/fp8.
    mult = max(8, 32 // itemsize)
    # Per-row VMEM cost: double-buffered input + output blocks in the I/O
    # dtype (4x) plus ~12 B/elem of in-kernel f32 temporaries.
    bytes_per_row = (4 * itemsize + _F32_TEMP_BYTES) * size
    cap = (block_budget // bytes_per_row) // mult * mult
    if cap < mult:
        return 0  # even a minimal sublane-aligned block would blow the budget
    cap = min(cap, MAX_ROW_TILE)

    # Target >= TARGET_STEPS grid steps so the pipeline has iterations to
    # overlap and v7x's two TensorCores get balanced shares of the row axis.
    target = max(mult, _round_up(_cdiv(rows, TARGET_STEPS), mult))
    row_tile = min(cap, target, _round_up(rows, mult))

    # Prefer an even number of grid steps (2-TC balance on v7x); best effort.
    steps = _cdiv(rows, row_tile)
    if steps > 1 and steps % 2 == 1:
        t = row_tile - mult
        while t >= mult:
            if _cdiv(rows, t) % 2 == 0:
                row_tile = t
                break
            t -= mult
    return row_tile


def _layer_norm_ref(x, weight, bias):
    """Pure-JAX LayerNorm (fallback path + correctness reference)."""
    x32 = x.astype(jnp.float32)
    mean = jnp.mean(x32, axis=-1, keepdims=True)
    var = jnp.mean((x32 - mean) ** 2, axis=-1, keepdims=True)
    y = (x32 - mean) * jax.lax.rsqrt(var + EPS) * weight + bias
    return y.astype(x.dtype)


def layer_norm_pallas(x, weight, bias):
    """LayerNorm over the last dim of x, eps=1e-5, elementwise affine."""
    orig_shape = x.shape
    size = orig_shape[-1]
    rows = 1
    for d in orig_shape[:-1]:
        rows *= d

    w32 = weight.astype(jnp.float32)
    b32 = bias.astype(jnp.float32)

    # Fallback: tiny tensors (launch + prologue/epilogue dominate) and
    # lane-sparse or misaligned hidden sizes (masked vst.msk partial stores
    # cost up to ~4x wall-minus-compute).
    if rows * size < MIN_PALLAS_ELEMS or size < 128 or size % 128 != 0:
        return _layer_norm_ref(x, w32, b32)

    x2d = x.reshape(rows, size)
    itemsize = x2d.dtype.itemsize
    block_budget, vmem_limit = _vmem_budgets()
    row_tile = _pick_row_tile(rows, size, itemsize, block_budget)
    if row_tile == 0:
        # Hidden dim too large even for a minimal sublane-aligned block.
        return _layer_norm_ref(x, w32, b32)

    w2d = w32.reshape(1, size)
    b2d = b32.reshape(1, size)

    # TODO(synk): with the smaller tiles / more steps, pipeline_mode=
    # pl.Buffered(3) on the x BlockSpec could hide residual DMA latency; left
    # at the default double-buffering pending a hardware sweep.
    out = pl.pallas_call(
        functools.partial(_layernorm_kernel, inv_size=1.0 / size),
        out_shape=jax.ShapeDtypeStruct((rows, size), x.dtype),
        grid_spec=pltpu.PrefetchScalarGridSpec(
            num_scalar_prefetch=0,
            grid=(_cdiv(rows, row_tile),),   # ragged tail clipped by Pallas
            in_specs=[
                pl.BlockSpec((row_tile, size), lambda i: (i, 0)),
                pl.BlockSpec((1, size), lambda i: (0, 0)),
                pl.BlockSpec((1, size), lambda i: (0, 0)),
            ],
            out_specs=pl.BlockSpec((row_tile, size), lambda i: (i, 0)),
        ),
        compiler_params=pltpu.CompilerParams(
            # "parallel" lets the independent row axis shard across v7x's 2
            # TensorCores; no-op on single-TC v5e/v6e.
            # TODO(synk): verify on v7x hardware whether CORE_PARALLEL is needed.
            dimension_semantics=("parallel",),
            vmem_limit_bytes=vmem_limit,
        ),
    )(x2d, w2d, b2d)

    return out.reshape(orig_shape)


class Norm:
    """JAX/Pallas equivalent of the PyTorch `Norm` module."""

    def __init__(self, fn, size):
        self.size = size
        self.fn = fn
        # nn.LayerNorm defaults: weight=1, bias=0. Kept as f32 attributes so
        # the cast happens once, not per grid step.
        self.weight = jnp.ones((size,), jnp.float32)
        self.bias = jnp.zeros((size,), jnp.float32)

    def __call__(self, x_data):
        if isinstance(x_data, dict):
            x_norm = self.fn(
                {
                    "x_a": x_data["x_a"],
                    "x_b": layer_norm_pallas(x_data["x_b"], self.weight, self.bias),
                }
            )
            return x_norm
        else:
            x, mask_info = x_data
            x_norm, _ = self.fn(
                (layer_norm_pallas(x, self.weight, self.bias), mask_info)
            )
            return (x_norm, mask_info)


if __name__ == "__main__":
    # `fn` stands in for the wrapped sub-module; identity-style callable here.
    # TODO(synk): real `fn` is user-provided (e.g. attention/MLP); not part of Norm itself.
    def identity_fn(data):
        return data

    key = jax.random.PRNGKey(0)
    k1, k2, k3, k4, kw, kb = jax.random.split(key, 6)

    # --- Pallas-path demo: lane-aligned hidden dim, >= MIN_PALLAS_ELEMS ---
    batch, seq, hidden = 2, 512, 256           # 2*512*256 = 2^18 elements
    norm = Norm(identity_fn, hidden)
    # Non-trivial affine params to actually exercise weight/bias in the kernel.
    norm.weight = 1.0 + 0.1 * jax.random.normal(kw, (hidden,), jnp.float32)
    norm.bias = 0.1 * jax.random.normal(kb, (hidden,), jnp.float32)

    x = jax.random.normal(k1, (batch, seq, hidden), jnp.float32)
    mask_info = jax.random.normal(k2, (batch, seq), jnp.float32)
    out_tuple = norm((x, mask_info))
    jax.block_until_ready(out_tuple[0])

    x_a = jax.random.normal(k3, (batch, seq, hidden), jnp.float32)
    out_dict = norm({"x_a": x_a, "x_b": x})
    jax.block_until_ready(out_dict["x_b"])

    ref = _layer_norm_ref(x, norm.weight, norm.bias)
    assert jnp.allclose(out_tuple[0], ref, atol=1e-4, rtol=1e-4)
    assert jnp.allclose(out_dict["x_b"], ref, atol=1e-4, rtol=1e-4)
    assert jnp.allclose(out_dict["x_a"], x_a)
    assert jnp.allclose(out_tuple[1], mask_info)

    # --- Tiny-input / lane-sparse fallback path (hidden=32) ---
    tiny_hidden = 32
    norm_tiny = Norm(identity_fn, tiny_hidden)
    x_tiny = jax.random.normal(k4, (2, 8, tiny_hidden), jnp.float32)
    mask_tiny = jnp.zeros((2, 8), jnp.float32)
    out_tiny = norm_tiny((x_tiny, mask_tiny))
    jax.block_until_ready(out_tiny[0])
    ref_tiny = _layer_norm_ref(x_tiny, norm_tiny.weight, norm_tiny.bias)
    assert jnp.allclose(out_tiny[0], ref_tiny, atol=1e-5, rtol=1e-5)

    print("KERNEL_OK")
</pallas_src>

<mosaic_0001>
module attributes {stable_mosaic.version = 11 : i64} {
  func.func @_layernorm_kernel(%arg0: i32, %arg1: memref<128x256xf32, #tpu.memory_space<vmem>>, %arg2: memref<1x256xf32, #tpu.memory_space<vmem>>, %arg3: memref<1x256xf32, #tpu.memory_space<vmem>>, %arg4: memref<128x256xf32, #tpu.memory_space<vmem>>) attributes {dimension_semantics = [#tpu.dimension_semantics<parallel>], iteration_bounds = array<i64: 8>, scalar_prefetch = 0 : i64, scratch_operands = 0 : i64, tpu.core_type = #tpu.core_type<tc>, window_params = [{transform_indices = @transform_0, window_bounds = array<i64: 128, 256>}, {pipeline_mode = #tpu.pipeline_mode<synchronous>, transform_indices = @transform_1, window_bounds = array<i64: 1, 256>}, {pipeline_mode = #tpu.pipeline_mode<synchronous>, transform_indices = @transform_2, window_bounds = array<i64: 1, 256>}, {transform_indices = @transform_3, window_bounds = array<i64: 128, 256>}]} {
    %c0 = arith.constant 0 : index
    %c0_0 = arith.constant 0 : index
    %0 = vector.load %arg1[%c0, %c0_0] : memref<128x256xf32, #tpu.memory_space<vmem>>, vector<128x256xf32>
    %cst = arith.constant dense<0.000000e+00> : vector<128xf32>
    %1 = vector.multi_reduction <add>, %0, %cst [1] : vector<128x256xf32> to vector<128xf32>
    %2 = vector.shape_cast %1 : vector<128xf32> to vector<128x1xf32>
    %3 = arith.mulf %0, %0 : vector<128x256xf32>
    %cst_1 = arith.constant dense<0.000000e+00> : vector<128xf32>
    %4 = vector.multi_reduction <add>, %3, %cst_1 [1] : vector<128x256xf32> to vector<128xf32>
    %5 = vector.shape_cast %4 : vector<128xf32> to vector<128x1xf32>
    %cst_2 = arith.constant 3.906250e-03 : f32
    %6 = vector.broadcast %cst_2 : f32 to vector<128x1xf32>
    %7 = arith.mulf %2, %6 : vector<128x1xf32>
    %cst_3 = arith.constant 3.906250e-03 : f32
    %8 = vector.broadcast %cst_3 : f32 to vector<128x1xf32>
    %9 = arith.mulf %5, %8 : vector<128x1xf32>
    %10 = arith.mulf %7, %7 : vector<128x1xf32>
    %11 = arith.subf %9, %10 : vector<128x1xf32>
    %cst_4 = arith.constant 0.000000e+00 : f32
    %12 = vector.broadcast %cst_4 : f32 to vector<128x1xf32>
    %13 = arith.maximumf %11, %12 : vector<128x1xf32>
    %14 = vector.broadcast %7 : vector<128x1xf32> to vector<128x256xf32>
    %15 = arith.subf %0, %14 : vector<128x256xf32>
    %cst_5 = arith.constant 9.99999974E-6 : f32
    %16 = vector.broadcast %cst_5 : f32 to vector<128x1xf32>
    %17 = arith.addf %13, %16 : vector<128x1xf32>
    %18 = math.rsqrt %17 : vector<128x1xf32>
    %19 = vector.broadcast %18 : vector<128x1xf32> to vector<128x256xf32>
    %20 = arith.mulf %15, %19 : vector<128x256xf32>
    %c0_6 = arith.constant 0 : index
    %c0_7 = arith.constant 0 : index
    %21 = vector.load %arg2[%c0_6, %c0_7] : memref<1x256xf32, #tpu.memory_space<vmem>>, vector<1x256xf32>
    %22 = vector.broadcast %21 : vector<1x256xf32> to vector<128x256xf32>
    %23 = arith.mulf %20, %22 : vector<128x256xf32>
    %c0_8 = arith.constant 0 : index
    %c0_9 = arith.constant 0 : index
    %24 = vector.load %arg3[%c0_8, %c0_9] : memref<1x256xf32, #tpu.memory_space<vmem>>, vector<1x256xf32>
    %25 = vector.broadcast %24 : vector<1x256xf32> to vector<128x256xf32>
    %26 = arith.addf %23, %25 : vector<128x256xf32>
    %c0_10 = arith.constant 0 : index
    %c0_11 = arith.constant 0 : index
    %27 = vector.load %arg4[%c0_10, %c0_11] : memref<128x256xf32, #tpu.memory_space<vmem>>, vector<128x256xf32>
    tpu.vector_store %arg4[%c0_10, %c0_11], %26 {strides = array<i32>} : memref<128x256xf32, #tpu.memory_space<vmem>>, vector<128x256xf32>,
    return
  }
  func.func @transform_0(%arg0: i32) -> (i32, i32) {
    %c0_i32 = arith.constant 0 : i32
    %c0_i32_0 = arith.constant 0 : i32
    return %arg0, %c0_i32 : i32, i32
  }
  func.func @transform_1(%arg0: i32) -> (i32, i32) {
    %c0_i32 = arith.constant 0 : i32
    %c0_i32_0 = arith.constant 0 : i32
    %c0_i32_1 = arith.constant 0 : i32
    return %c0_i32, %c0_i32_0 : i32, i32
  }
  func.func @transform_2(%arg0: i32) -> (i32, i32) {
    %c0_i32 = arith.constant 0 : i32
    %c0_i32_0 = arith.constant 0 : i32
    %c0_i32_1 = arith.constant 0 : i32
    return %c0_i32, %c0_i32_0 : i32, i32
  }
  func.func @transform_3(%arg0: i32) -> (i32, i32) {
    %c0_i32 = arith.constant 0 : i32
    %c0_i32_0 = arith.constant 0 : i32
    return %arg0, %c0_i32 : i32, i32
  }
}

</mosaic_0001>

<bundles_post_ra>
// kernel: tpu_custom_call.1
= control target key start
LH: loop header
LB: loop body
LE: loop exit
PB: predicated region body
PF: predicated region fallthrough
CT: control target
= control target key end

     0   :  { %8 = vsyncpa [#allocation3], 0  ;;  %s1651_s0 = inlined_call_operand.hbm [shape: f32[1024,256], index: 0, kind: input, shape index: {}]   ;;  %s1652_s1 = inlined_call_operand.vmem [shape: f32[1,256], index: 1, kind: input, shape index: {}]   ;;  %s1653_s2 = inlined_call_operand.vmem [shape: f32[1,256], index: 2, kind: input, shape index: {}]   ;;  %s1654_s3 = inlined_call_operand.hbm [shape: f32[1024,256], index: 3, kind: output, shape index: {}]  }
   0x1   :  { %10 = vsyncpa [#allocation3 + $0x1], 0 }
   0x2   :  { %11 = vsyncpa [#allocation4], 0 }
   0x3   :  { %13 = vsyncpa [#allocation4 + $0x1], 0  ;;  %s962_s12 = smov 0   ;;  %s964_s13 = smov 0  }
   0x4   :  { %s966_s14 = smov 0   ;;  %s968_s15 = smov 0  }
   0x5 LB: > { %s983_s16 = sadd.s32 4294967295, %s934_s15   ;;  %s736_s17 = sadd.s32 4294967294, %s934_s15   ;;  %s934_s15 = sphi %s968_s15, %s1724_s15   ;;  %s930_s14 = sphi %s966_s14, %s1723_s14   ;;  %s926_s13 = sphi %s964_s13, %s1722_s13   ;;  %s922_s12 = sphi %s962_s12, %s1721_s12  }
   0x6   : > { %s987_s18 = sadd.s32 1, %s934_s15   ;;  %s26_s19 = sadd.s32 1, %s930_s14 }
   0x7   : > { %s23_s20 = ssub.s32 %s934_s15, %s987_s18  ;;  %p33_p0 = scmp.ne.s32.totalorder %s930_s14, %s926_s13 }
   0x8   : > { %p24_p1 = scmp.eq.s32.totalorder %s23_s20, 0  ;;  %p34_p2 = scmp.eq.s32.totalorder %s934_s15, 0 }
   0x9   : > { %p39_p3 = scmp.ne.s32.totalorder %s926_s13, %s922_s12  ;;  %p40_p4 = scmp.eq.s32.totalorder %s983_s16, 0 }
   0xa   : > { %s999_s21 = scalar_select %p24_p1, %s930_s14, %s26_s19  }
   0xb   : > { %p1001_p5 = por %p34_p2, %p33_p0  ;;  %p1005_p6 = por %p40_p4, %p39_p3 }
   0xc   : > { %p105_p7 = scmp.eq.s32.totalorder %s983_s16, 7  ;;  %p111_p8 = scmp.eq.s32.totalorder %s736_s17, 7 }
   0xd   : > { %p768_p9 = scmp.lt.s32.totalorder %s934_s15, 8  ;;  %s137_s26 = sand.u32 1, %s930_s14  }
   0xe   : > { %p1011_p10 = por %p105_p7, %p33_p0  ;;  %p1015_p11 = por %p111_p8, %p39_p3 }
   0xf   : > { %s753_s27 = sshll.u32 %s934_s15, 12  ;;  %s739_s28 = sshll.u32 %s137_s26, 8 }
  0x10   : > { %s1673_s24 = scalar_select %p1011_p10, 1, 0 }
  0x11   : > { %s1674_s25 = scalar_select %p1015_p11, 1, 0 }
  0x12   : > { %s1024_s4 = scalar_lea.hbm %s1651_s0, %s753_s27  ;;  %s141_s5 = scalar_lea.vmem [#allocation2], %s739_s28 }
  0x13   : > { %s149_s6 = sshll.u32 %s141_s5, 4  ;;  %p1028_p12 = pnand %p768_p9, %p1001_p5  ;;  %s1032_s6 = int_to_ptr.vmem [resolvable:$true] %s149_s6 }
  0x14   : > { %s1034_s8 = scalar_lea.sflag [#allocation3], %s137_s26  ;;  %s838_s9 = scalar_lea.hbm %s1024_s4, 4096 }
  0x15   : > { %p839_p13 = scmp.ne.s32.totalorder %s1024_s4, %s838_s9  ;;  %p840_p0 = pneg %p1028_p12 }
  0x16   : > { %s843_s17 = scalar_lea.hbm %s1651_s0, 32768  ;;  %p844_p3 = scmp.lt.u32.totalorder %s1024_s4, %s1651_s0 }
  0x17   : > { %p841_p1 = pnand %p840_p0, %p839_p13  ;;  %p845_p4 = scmp.lt.u32.totalorder %s843_s17, %s838_s9 }
  0x18   : > { %p847_p7 = scmp.lt.u32.totalorder %s838_s9, %s1024_s4 }
  0x19   : > { %p842_p2 = pneg %p841_p1  ;;  %p846_p5 = por %p845_p4, %p844_p3 }
  0x1b   : > { %p848_p8 = por %p847_p7, %p846_p5 }
  0x1d   : > { %p849_p9 = pnand %p848_p8, %p842_p2 }
  0x1f   : > { %852 = shalt.err (!%p849_p9)
}
  0x20   : > { %s853_s22 = scalar_lea.vmem %s1032_s6, 4096  ;;  %s936_s26 = smov [#allocation2]  }
  0x21   : > { %p854_p13 = scmp.ne.s32.totalorder %s1032_s6, %s853_s22  ;;  %s858_s27 = sshll.u32 %s936_s26, 4  ;;  %s859_s27 = int_to_ptr.vmem [resolvable:$false] %s858_s27 }
  0x22   : > { %s860_s28 = scalar_lea.vmem %s859_s27, 8192  ;;  %p861_p10 = scmp.lt.s32.totalorder %s1032_s6, %s859_s27 }
  0x23   : > { %p856_p1 = pnand %p854_p13, %p840_p0  ;;  %p862_p3 = scmp.lt.s32.totalorder %s860_s28, %s853_s22 }
  0x25   : > { %p857_p11 = pneg %p856_p1  ;;  %p863_p4 = por %p862_p3, %p861_p10 }
  0x27   : > { %p864_p5 = pnand %p863_p4, %p857_p11 }
  0x29   : > { %867 = shalt.err (!%p864_p5)
}
  0x2a   : > { %s937_s29 = smov 256   ;;  %s938_s30 = smov 16  }
  0x2b   : > { %763 = dma.hbm_to_vmem [thread:$0]  (!%p1028_p12), %s1024_s4, 4096, %s1032_s6, %s1034_s8, %s937_s29, %s937_s29, %s938_s30  }
  0x2c   : > { %p743_p0 = scmp.ge.s32.totalorder %s934_s15, 1  ;;  %p157_p2 = scmp.lt.s32.totalorder %s934_s15, 9 }
  0x2e   : > { %p158_p7 = pnand %p743_p0, %p157_p2 }
  0x30   : > { %161 = sbr.rel (%p158_p7) target bundleno = 319 (0x13f), region = 32 }
  0x37   : > { %s1065_s5 = sand.u32 1, %s926_s13  }
  0x38   : > { %s744_s9 = sshll.u32 %s1065_s5, 8  ;;  %s164_s10 = scalar_lea.sflag [#allocation3], %s1065_s5 }
  0x39   : > { %s1071_s11 = scalar_lea.vmem [#allocation2], %s744_s9 }
  0x3a   : > { %913 = dma.done.wait (%p1005_p6), %s164_s10, 4096  }
  0x3b   : > { %915 = vsyncadd (%p1005_p6), %s164_s10, 4294963200  ;;  %v1078_v0 = vld [vmem:[%s1071_s11 + $0x20] sm:$0xff]  ;;  %v1081_v1 = vld [vmem:[%s1071_s11 + $0x28] sm:$0xff]  ;;  %s1445_s8 = scalar_lea.vmem [#allocation5], %s744_s9  ;;  %s755_s17 = sshll.u32 %s983_s16, 12 }
  0x3c   : > { %v1084_v2 = vld [vmem:[%s1071_s11] sm:$0xff]  ;;  %v230_v3 = vadd.f32 %v1081_v1, %v1078_v0  ;;  %v1089_v4 = vld [vmem:[%s1071_s11 + $0x8] sm:$0xff]  ;;  %v1092_v5 = vld [vmem:[%s1071_s11 + $0x30] sm:$0xff]  ;;  %v276_v56 = vmul.f32 %v1078_v0, %v1078_v0  ;;  %v277_v57 = vmul.f32 %v1081_v1, %v1081_v1  ;;  %s663_s19 = sshll.u32 %s1445_s8, 4  ;;  %s1600_s22 = scalar_lea.hbm %s1654_s3, %s755_s17  ;;  %s1602_s19 = int_to_ptr.vmem [resolvable:$true] %s663_s19 }
  0x3d   : > { %v1095_v6 = vld [vmem:[%s1071_s11 + $0x38] sm:$0xff]  ;;  %v224_v7 = vadd.f32 %v1089_v4, %v1084_v2  ;;  %v1100_v8 = vld [vmem:[%s1071_s11 + $0x10] sm:$0xff]  ;;  %v1116_v14 = vld [vmem:[%s1071_s11 + $0x40] sm:$0xff]  ;;  %v272_v50 = vmul.f32 %v1084_v2, %v1084_v2  ;;  %v273_v51 = vmul.f32 %v1089_v4, %v1089_v4  ;;  %v278_v53 = vmul.f32 %v1092_v5, %v1092_v5  ;;  %s649_s26 = scalar_lea.sflag [#allocation4], %s1065_s5  ;;  %s868_s27 = scalar_lea.vmem %s1602_s19, 4096 }
  0x3e   : > { %v1103_v9 = vld [vmem:[%s1071_s11 + $0x18] sm:$0xff]  ;;  %231 = vadd.xlane.f32.xlu1 %v230_v3  ;;  %v233_v10 = vadd.f32 %v1095_v6, %v1092_v5  ;;  %v1110_v12 = vld [vmem:[%s1071_s11 + $0x50] sm:$0xff]  ;;  %v1119_v15 = vld [vmem:[%s1071_s11 + $0x48] sm:$0xff]  ;;  %v274_v47 = vmul.f32 %v1100_v8, %v1100_v8  ;;  %v279_v54 = vmul.f32 %v1095_v6, %v1095_v6  ;;  %v310_v61 = vadd.f32 %v277_v57, %v276_v56  ;;  %p869_p6 = scmp.ne.s32.totalorder %s1602_s19, %s868_s27  ;;  %p1719_p10 = scmp.ne.s32.totalorder %s1673_s24, 0 }
  0x3f   : > { %225 = vadd.xlane.f32.xlu0 %v224_v7  ;;  %v227_v11 = vadd.f32 %v1103_v9, %v1100_v8  ;;  %v1113_v13 = vld [vmem:[%s1071_s11 + $0x58] sm:$0xff]  ;;  %v236_v17 = vadd.f32 %v1119_v15, %v1116_v14  ;;  %v1126_v18 = vld [vmem:[%s1071_s11 + $0x70] sm:$0xff]  ;;  %v1132_v20 = vld [vmem:[%s1071_s11 + $0x60] sm:$0xff]  ;;  %v275_v48 = vmul.f32 %v1103_v9, %v1103_v9  ;;  %v304_v55 = vadd.f32 %v273_v51, %v272_v50  ;;  %s939_s28 = smov [#allocation5]  }
  0x40   : > { %v239_v16 = vadd.f32 %v1113_v13, %v1110_v12  ;;  %v1129_v19 = vld [vmem:[%s1071_s11 + $0x78] sm:$0xff]  ;;  %v1135_v21 = vld [vmem:[%s1071_s11 + $0x68] sm:$0xff]  ;;  %v1142_v24 = vld [vmem:[%s1071_s11 + $0x90] sm:$0xff]  ;;  %v313_v58 = vadd.f32 %v279_v54, %v278_v53  ;;  %v282_v59 = vmul.f32 %v1110_v12, %v1110_v12  ;;  %v283_v60 = vmul.f32 %v1113_v13, %v1113_v13  ;;  %p870_p11 = pnand %p869_p6, %p1719_p10  ;;  %s872_s29 = sshll.u32 %s939_s28, 4  ;;  %s873_s29 = int_to_ptr.vmem [resolvable:$false] %s872_s29 }
  0x41   : > { %v245_v22 = vadd.f32 %v1129_v19, %v1126_v18  ;;  %v242_v23 = vadd.f32 %v1135_v21, %v1132_v20  ;;  %v1145_v25 = vld [vmem:[%s1071_s11 + $0x98] sm:$0xff]  ;;  %v1148_v26 = vld [vmem:[%s1071_s11 + $0x80] sm:$0xff]  ;;  %v1151_v27 = vld [vmem:[%s1071_s11 + $0x88] sm:$0xff]  ;;  %v307_v52 = vadd.f32 %v275_v48, %v274_v47  ;;  %v280_v62 = vmul.f32 %v1116_v14, %v1116_v14  ;;  %s874_s30 = scalar_lea.vmem %s873_s29, 8192  ;;  %p875_p8 = scmp.lt.s32.totalorder %s1602_s19, %s873_s29 }
  0x42   : > { %234 = vadd.xlane.f32.xlu1 %v233_v10  ;;  %v251_v28 = vadd.f32 %v1145_v25, %v1142_v24  ;;  %v248_v29 = vadd.f32 %v1151_v27, %v1148_v26  ;;  %v1158_v30 = vld [vmem:[%s1071_s11 + $0xb0] sm:$0xff]  ;;  %v1161_v31 = vld [vmem:[%s1071_s11 + $0xb8] sm:$0xff]  ;;  %v1164_v32 = vld [vmem:[%s1071_s11 + $0xa0] sm:$0xff]  ;;  %v281_v63 = vmul.f32 %v1119_v15, %v1119_v15  ;;  %v319_v3 = vadd.f32 %v283_v60, %v282_v59  ;;  %p871_p12 = pneg %p870_p11  ;;  %p876_p9 = scmp.lt.s32.totalorder %s874_s30, %s868_s27 }
  0x43   : > { %228 = vadd.xlane.f32.xlu0 %v227_v11  ;;  %v1167_v33 = vld [vmem:[%s1071_s11 + $0xa8] sm:$0xff]  ;;  %v257_v34 = vadd.f32 %v1161_v31, %v1158_v30  ;;  %v1174_v36 = vld [vmem:[%s1071_s11 + $0xd0] sm:$0xff]  ;;  %v1177_v37 = vld [vmem:[%s1071_s11 + $0xd8] sm:$0xff]  ;;  %v286_v7 = vmul.f32 %v1126_v18, %v1126_v18  ;;  %v287_v10 = vmul.f32 %v1129_v19, %v1129_v19  ;;  %v292_v48 = vmul.f32 %v1164_v32, %v1164_v32 }
  0x44   : > { %1676 = vst [vmem:[#allocation8_spill] sm:$0xff] %v1167_v33  ;;  %v254_v35 = vadd.f32 %v1167_v33, %v1164_v32  ;;  %1677 = vst [vmem:[#allocation9_spill] sm:$0xff] %v1174_v36  ;;  %v1180_v38 = vld [vmem:[%s1071_s11 + $0xc0] sm:$0xff]  ;;  %v1183_v39 = vld [vmem:[%s1071_s11 + $0xc8] sm:$0xff]  ;;  %v263_v40 = vadd.f32 %v1177_v37, %v1174_v36  ;;  %v316_v11 = vadd.f32 %v281_v63, %v280_v62  ;;  %p877_p13 = por %p876_p9, %p875_p8 }
  0x45   : > { %1678 = vst [vmem:[#allocation10_spill] sm:$0xff] %v1177_v37  ;;  %1679 = vst [vmem:[#allocation11_spill] sm:$0xff] %v1180_v38  ;;  %v260_v41 = vadd.f32 %v1183_v39, %v1180_v38  ;;  %v1190_v42 = vld [vmem:[%s1071_s11 + $0xf0] sm:$0xff]  ;;  %v1193_v43 = vld [vmem:[%s1071_s11 + $0xf8] sm:$0xff]  ;;  %v298_v51 = vmul.f32 %v1174_v36, %v1174_v36  ;;  %v296_v54 = vmul.f32 %v1180_v38, %v1180_v38 }
  0x46   : > { %240 = vadd.xlane.f32.xlu1 %v239_v16  ;;  %1680 = vst [vmem:[#allocation12_spill] sm:$0xff] %v1183_v39  ;;  %1681 = vst [vmem:[#allocation13_spill] sm:$0xff] %v1190_v42  ;;  %v1196_v44 = vld [vmem:[%s1071_s11 + $0xe0] sm:$0xff]  ;;  %v1199_v45 = vld [vmem:[%s1071_s11 + $0xe8] sm:$0xff]  ;;  %v269_v46 = vadd.f32 %v1193_v43, %v1190_v42  ;;  %v284_v16 = vmul.f32 %v1132_v20, %v1132_v20  ;;  %v302_v57 = vmul.f32 %v1190_v42, %v1190_v42  ;;  %p878_p1 = pnand %p877_p13, %p871_p12 }
  0x47   : > { %237 = vadd.xlane.f32.xlu0 %v236_v17  ;;  %1682 = vst [vmem:[#allocation14_spill] sm:$0xff] %v1193_v43  ;;  %1683 = vst [vmem:[#allocation15_spill] sm:$0xff] %v1196_v44  ;;  %v266_v49 = vadd.f32 %v1199_v45, %v1196_v44  ;;  %v285_v17 = vmul.f32 %v1135_v21, %v1135_v21  ;;  %v300_v60 = vmul.f32 %v1196_v44, %v1196_v44 }
  0x48   : > { %1684 = vst [vmem:[#allocation16_spill] sm:$0xff] %v1199_v45 }
  0x4a   : > { %246 = vadd.xlane.f32.xlu1 %v245_v22  ;;  %v325_v22 = vadd.f32 %v287_v10, %v286_v7 }
  0x4b   : > { %243 = vadd.xlane.f32.xlu0 %v242_v23  ;;  %v290_v23 = vmul.f32 %v1142_v24, %v1142_v24 }
  0x4e   : > { %252 = vadd.xlane.f32.xlu1 %v251_v28  ;;  %v291_v28 = vmul.f32 %v1145_v25, %v1145_v25 }
  0x4f   : > { %249 = vadd.xlane.f32.xlu0 %v248_v29  ;;  %v322_v29 = vadd.f32 %v285_v17, %v284_v16 }
  0x52   : > { %258 = vadd.xlane.f32.xlu1 %v257_v34  ;;  %v288_v34 = vmul.f32 %v1148_v26, %v1148_v26 }
  0x53   : > { %255 = vadd.xlane.f32.xlu0 %v254_v35  ;;  %v289_v35 = vmul.f32 %v1151_v27, %v1151_v27 }
  0x55   : > { %v328_v47 = vadd.f32 %v289_v35, %v288_v34  ;;  %v530_v34 = vlaneseq }
  0x56   : > { %264 = vadd.xlane.f32.xlu1 %v263_v40  ;;  %v331_v40 = vadd.f32 %v291_v28, %v290_v23 }
  0x57   : > { %261 = vadd.xlane.f32.xlu0 %v260_v41  ;;  %v294_v41 = vmul.f32 %v1158_v30, %v1158_v30 }
  0x5a   : > { %270 = vadd.xlane.f32.xlu1 %v269_v46  ;;  %v295_v46 = vmul.f32 %v1161_v31, %v1161_v31 }
  0x5b   : > { %267 = vadd.xlane.f32.xlu0 %v266_v49  ;;  %v293_v49 = vmul.f32 %v1167_v33, %v1167_v33 }
  0x5c   : > { %v337_v50 = vadd.f32 %v295_v46, %v294_v41  ;;  %v531_v41 = vshrl.u32 %v530_v34, 7 }
  0x5d   : > { %v334_v53 = vadd.f32 %v293_v49, %v292_v48 }
  0x5e   : > { %308 = vadd.xlane.f32.xlu1 %v307_v52  ;;  %v299_v52 = vmul.f32 %v1177_v37, %v1177_v37  ;;  %v532_v48 = vsub.s32 0, %v531_v41  ;;  %v536_v49 = vsub.s32 1, %v531_v41 }
  0x5f   : > { %305 = vadd.xlane.f32.xlu0 %v304_v55  ;;  %v297_v55 = vmul.f32 %v1183_v39, %v1183_v39 }
  0x60   : > { %v343_v56 = vadd.f32 %v299_v52, %v298_v51  ;;  %v528_v51 = vld [vmem:[%s1652_s1] sm:$0x3] }
  0x61   : > { %v340_v59 = vadd.f32 %v297_v55, %v296_v54 }
  0x62   : > { %314 = vadd.xlane.f32.xlu1 %v313_v58  ;;  %v303_v58 = vmul.f32 %v1193_v43, %v1193_v43 }
  0x63   : > { %311 = vadd.xlane.f32.xlu0 %v310_v61  ;;  %v301_v61 = vmul.f32 %v1199_v45, %v1199_v45 }
  0x64   : > { %v349_v62 = vadd.f32 %v303_v58, %v302_v57  ;;  %v1295_v58 = vrot.slane %v528_v51, %v532_v48 }
  0x65   : > { %v346_v63 = vadd.f32 %v301_v61, %v300_v60 }
  0x66   : > { %320 = vadd.xlane.f32.xlu1 %v319_v3 }
  0x67   : > { %317 = vadd.xlane.f32.xlu0 %v316_v11 }
  0x6a   : > { %326 = vadd.xlane.f32.xlu1 %v325_v22 }
  0x6b   : > { %323 = vadd.xlane.f32.xlu0 %v322_v29 }
  0x6e   : > { %332 = vadd.xlane.f32.xlu1 %v331_v40 }
  0x6f   : > { %329 = vadd.xlane.f32.xlu0 %v328_v47 }
  0x72   : > { %338 = vadd.xlane.f32.xlu1 %v337_v50 }
  0x73   : > { %335 = vadd.xlane.f32.xlu0 %v334_v53  ;;  %v572_v53 = vld [vmem:[%s1653_s2] sm:$0x3] }
  0x76   : > { %344 = vadd.xlane.f32.xlu1 %v343_v56 }
  0x77   : > { %341 = vadd.xlane.f32.xlu0 %v340_v59  ;;  %v1297_v59 = vrot.slane %v528_v51, %v536_v49 }
  0x7a   : > { %350 = vadd.xlane.f32.xlu1 %v349_v62  ;;  %v1303_v62 = vrot.slane %v572_v53, %v532_v48 }
  0x7b   : > { %347 = vadd.xlane.f32.xlu0 %v346_v63  ;;  %v1305_v63 = vrot.slane %v572_v53, %v536_v49 }
  0xcb   : > { %v232_v3 = vpop.xlane.xlu1 %231 }
  0xcc   : > { %v226_v7 = vpop.xlane.xlu0 %225  ;;  %v1277_v50 = vmul.f32 0.00390625, %v232_v3 }
  0xcd   : > { %v1282_v52 = vmul.f32 0.00390625, %v226_v7 }
  0xcf   : > { %v235_v10 = vpop.xlane.xlu1 %234  ;;  %v384_v49 = vmul.f32 %v1282_v52, %v1282_v52 }
  0xd0   : > { %v229_v11 = vpop.xlane.xlu0 %228  ;;  %v1287_v54 = vmul.f32 0.00390625, %v235_v10 }
  0xd1   : > { %v1291_v56 = vmul.f32 0.00390625, %v229_v11  ;;  %v386_v11 = vmul.f32 %v1277_v50, %v1277_v50 }
  0xd2   : > { %v387_v10 = vmul.f32 %v1287_v54, %v1287_v54 }
  0xd3   : > { %v241_v16 = vpop.xlane.xlu1 %240  ;;  %v385_v3 = vmul.f32 %v1291_v56, %v1291_v56 }
  0xd4   : > { %v238_v17 = vpop.xlane.xlu0 %237  ;;  %v1301_v61 = vmul.f32 0.00390625, %v241_v16 }
  0xd5   : > { %v1319_v41 = vmul.f32 0.00390625, %v238_v17 }
  0xd6   : > { %v389_v44 = vmul.f32 %v1301_v61, %v1301_v61 }
  0xd7   : > { %v247_v22 = vpop.xlane.xlu1 %246 }
  0xd8   : > { %v244_v23 = vpop.xlane.xlu0 %243  ;;  %v1323_v51 = vmul.f32 0.00390625, %v247_v22 }
  0xdb   : > { %v253_v28 = vpop.xlane.xlu1 %252 }
  0xdc   : > { %v250_v29 = vpop.xlane.xlu0 %249 }
  0xdd   : > { %v1357_v16 = vmul.f32 0.00390625, %v250_v29 }
  0xdf   : > { %v1269_v35 = vpop.xlane.xlu1 %258 }
  0xe0   : > { %v1271_v40 = vpop.xlane.xlu0 %255 }
  0xe3   : > { %v1273_v46 = vpop.xlane.xlu1 %264 }
  0xe4   : > { %v1275_v47 = vpop.xlane.xlu0 %261 }
  0xe7   : > { %v1289_v55 = vpop.xlane.xlu1 %270 }
  0xe8   : > { %v1293_v57 = vpop.xlane.xlu0 %267 }
  0xeb   : > { %v309_v48 = vpop.xlane.xlu1 %308 }
  0xec   : > { %v369_v53 = vmul.f32 0.00390625, %v309_v48  ;;  %v306_v60 = vpop.xlane.xlu0 %305  ;;  %v1337_v48 = vmul.f32 0.00390625, %v244_v23  ;;  %v1349_v23 = vmul.f32 0.00390625, %v253_v28 }
  0xed   : > { %v368_v7 = vmul.f32 0.00390625, %v306_v60  ;;  %v388_v60 = vmul.f32 %v1319_v41, %v1319_v41 }
  0xee   : > { %v401_v45 = vsub.f32 %v369_v53, %v385_v3 }
  0xef   : > { %v400_v17 = vsub.f32 %v368_v7, %v384_v49  ;;  %v315_v42 = vpop.xlane.xlu1 %314  ;;  %v391_v7 = vmul.f32 %v1323_v51, %v1323_v51 }
  0xf0   : > { %v417_v3 = vmax.f32 %v401_v45, 0.0  ;;  %v371_v53 = vmul.f32 0.00390625, %v315_v42  ;;  %v312_v34 = vpop.xlane.xlu0 %311 }
  0xf1   : > { %v416_v43 = vmax.f32 %v400_v17, 0.0  ;;  %v370_v38 = vmul.f32 0.00390625, %v312_v34  ;;  %v390_v17 = vmul.f32 %v1337_v48, %v1337_v48  ;;  %v1372_v34 = vmul.f32 0.00390625, %v1269_v35 }
  0xf2   : > { %v465_v37 = vadd.f32 1e-05, %v417_v3  ;;  %v403_v22 = vsub.f32 %v371_v53, %v387_v10  ;;  %v393_v53 = vmul.f32 %v1349_v23, %v1349_v23 }
  0xf3   : > { %v464_v42 = vadd.f32 1e-05, %v416_v43  ;;  %v402_v28 = vsub.f32 %v370_v38, %v386_v11  ;;  %v321_v36 = vpop.xlane.xlu1 %320  ;;  %v1384_v38 = vmul.f32 0.00390625, %v1289_v55 }
  0xf4   : > { %806 = vrsqrt.f32 %v465_v37  ;;  %v419_v39 = vmax.f32 %v403_v22, 0.0  ;;  %v373_v33 = vmul.f32 0.00390625, %v321_v36  ;;  %v318_v49 = vpop.xlane.xlu0 %317  ;;  %v1375_v36 = vmul.f32 0.00390625, %v1271_v40 }
  0xf5   : > { %808 = vrsqrt.f32 %v464_v42  ;;  %v418_v10 = vmax.f32 %v402_v28, 0.0  ;;  %v372_v3 = vmul.f32 0.00390625, %v318_v49  ;;  %v1378_v42 = vmul.f32 0.00390625, %v1273_v46  ;;  %1687 = vst [vmem:[#allocation19_spill] sm:$0xff] %v1384_v38 }
  0xf6   : > { %v467_v43 = vadd.f32 1e-05, %v419_v39  ;;  %v405_v11 = vsub.f32 %v373_v33, %v389_v44  ;;  %v1381_v33 = vmul.f32 0.00390625, %v1275_v47  ;;  %v1394_v47 = vmul.f32 %v1375_v36, %v1375_v36 }
  0xf7   : > { %v466_v37 = vadd.f32 1e-05, %v418_v10  ;;  %v404_v22 = vsub.f32 %v372_v3, %v388_v60  ;;  %v327_v29 = vpop.xlane.xlu1 %326  ;;  %1685 = vst [vmem:[#allocation17_spill] sm:$0xff] %v1378_v42  ;;  %v392_v60 = vmul.f32 %v1357_v16, %v1357_v16 }
  0xf8   : > { %810 = vrsqrt.f32 %v467_v43  ;;  %v421_v49 = vmax.f32 %v405_v11, 0.0  ;;  %v375_v28 = vmul.f32 0.00390625, %v327_v29  ;;  %v324_v39 = vpop.xlane.xlu0 %323  ;;  %1686 = vst [vmem:[#allocation18_spill] sm:$0xff] %v1381_v33  ;;  %v1390_v29 = vmul.f32 %v1372_v34, %v1372_v34 }
  0xf9   : > { %812 = vrsqrt.f32 %v466_v37  ;;  %v420_v44 = vmax.f32 %v404_v22, 0.0  ;;  %v374_v35 = vmul.f32 0.00390625, %v324_v39  ;;  %v1405_v39 = vmul.f32 0.00390625, %v1293_v57 }
  0xfa   : > { %v469_v40 = vadd.f32 1e-05, %v421_v49  ;;  %v407_v10 = vsub.f32 %v375_v28, %v391_v7  ;;  %v1398_v7 = vmul.f32 %v1378_v42, %v1378_v42  ;;  %v1402_v49 = vmul.f32 %v1381_v33, %v1381_v33 }
  0xfb   : > { %v468_v46 = vadd.f32 1e-05, %v420_v44  ;;  %v406_v3 = vsub.f32 %v374_v35, %v390_v17  ;;  %v333_v43 = vpop.xlane.xlu1 %332  ;;  %v1690_v57 = vsub.f32 %v1084_v2, %v1282_v52 }
  0xfc   : > { %814 = vrsqrt.f32 %v469_v40  ;;  %v423_v11 = vmax.f32 %v407_v10, 0.0  ;;  %v377_v55 = vmul.f32 0.00390625, %v333_v43  ;;  %v330_v37 = vpop.xlane.xlu0 %329  ;;  %v1409_v40 = vmul.f32 %v1384_v38, %v1384_v38 }
  0xfd   : > { %816 = vrsqrt.f32 %v468_v46  ;;  %v422_v22 = vmax.f32 %v406_v3, 0.0  ;;  %v376_v17 = vmul.f32 0.00390625, %v330_v37  ;;  %v1688_v46 = vsub.f32 %v1100_v8, %v1291_v56 }
  0xfe   : > { %v807_v28 = vpop.eup %806  ;;  %v471_v44 = vadd.f32 1e-05, %v423_v11  ;;  %v409_v35 = vsub.f32 %v377_v55, %v393_v53  ;;  %v1689_v43 = vsub.f32 %v1103_v9, %v1291_v56  ;;  %v1691_v11 = vsub.f32 %v1089_v4, %v1282_v52 }
  0xff   : > { %v809_v10 = vpop.eup %808  ;;  %v498_v3 = vmul.f32 %v807_v28, %v1688_v46  ;;  %v470_v45 = vadd.f32 1e-05, %v422_v22  ;;  %v408_v33 = vsub.f32 %v376_v17, %v392_v60  ;;  %v339_v42 = vpop.xlane.xlu1 %338 }
 0x100   : > { %v499_v37 = vmul.f32 %v807_v28, %v1689_v43  ;;  %v496_v53 = vmul.f32 %v809_v10, %v1690_v57  ;;  %v497_v55 = vmul.f32 %v809_v10, %v1691_v11  ;;  %818 = vrsqrt.f32 %v471_v44  ;;  %v336_v10 = vpop.xlane.xlu0 %335 }
 0x101   : > { %v425_v38 = vmax.f32 %v409_v35, 0.0  ;;  %v542_v8 = vmul.f32 %v1295_v58, %v498_v3  ;;  %820 = vrsqrt.f32 %v470_v45  ;;  %v424_v9 = vmax.f32 %v408_v33, 0.0 }
 0x102   : > { %v543_v46 = vmul.f32 %v1297_v59, %v499_v37  ;;  %v811_v56 = vpop.eup %810  ;;  %v540_v60 = vmul.f32 %v1295_v58, %v496_v53  ;;  %v541_v22 = vmul.f32 %v1297_v59, %v497_v55  ;;  %v379_v17 = vmul.f32 0.00390625, %v339_v42 }
 0x103   : > { %v473_v2 = vadd.f32 1e-05, %v425_v38  ;;  %v813_v28 = vpop.eup %812  ;;  %v586_v4 = vadd.f32 %v1303_v62, %v542_v8  ;;  %v1692_v44 = vsub.f32 %v1092_v5, %v1287_v54  ;;  %v1693_v45 = vsub.f32 %v1095_v6, %v1287_v54 }
 0x104   : > { %v587_v52 = vadd.f32 %v1305_v63, %v543_v46  ;;  %v584_v3 = vadd.f32 %v1303_v62, %v540_v60  ;;  %v585_v43 = vadd.f32 %v1305_v63, %v541_v22  ;;  %v1694_v38 = vsub.f32 %v1078_v0, %v1277_v50 }
 0x105   : > { %v502_v35 = vmul.f32 %v811_v56, %v1692_v44  ;;  %v503_v33 = vmul.f32 %v811_v56, %v1693_v45  ;;  %v1695_v37 = vsub.f32 %v1081_v1, %v1277_v50  ;;  %618 = vst [vmem:[%s1445_s8 + $0x10] sm:$0xff] %v586_v4  ;;  %822 = vrsqrt.f32 %v473_v2  ;;  %v345_v2 = vpop.xlane.xlu1 %344 }
 0x106   : > { %v500_v42 = vmul.f32 %v813_v28, %v1694_v38  ;;  %619 = vst [vmem:[%s1445_s8 + $0x18] sm:$0xff] %v587_v52  ;;  %v472_v0 = vadd.f32 1e-05, %v424_v9  ;;  %v815_v54 = vpop.eup %814  ;;  %616 = vst [vmem:[%s1445_s8] sm:$0xff] %v584_v3  ;;  %v411_v53 = vsub.f32 %v379_v17, %v1390_v29  ;;  %v378_v11 = vmul.f32 0.00390625, %v336_v10 }
 0x107   : > { %v501_v57 = vmul.f32 %v813_v28, %v1695_v37  ;;  %v546_v5 = vmul.f32 %v1295_v58, %v502_v35  ;;  %v547_v6 = vmul.f32 %v1297_v59, %v503_v33  ;;  %617 = vst [vmem:[%s1445_s8 + $0x8] sm:$0xff] %v585_v43  ;;  %v817_v55 = vpop.eup %816  ;;  %v1696_v9 = vsub.f32 %v1110_v12, %v1301_v61  ;;  %v342_v35 = vpop.xlane.xlu0 %341 }
 0x108   : > { %v544_v1 = vmul.f32 %v1295_v58, %v500_v42  ;;  %v1697_v60 = vsub.f32 %v1113_v13, %v1301_v61  ;;  %v1698_v17 = vsub.f32 %v1116_v14, %v1319_v41  ;;  %v1699_v52 = vsub.f32 %v1119_v15, %v1319_v41 }
 0x109   : > { %v545_v50 = vmul.f32 %v1297_v59, %v501_v57  ;;  %v590_v8 = vadd.f32 %v1303_v62, %v546_v5  ;;  %v591_v46 = vadd.f32 %v1305_v63, %v547_v6  ;;  %v506_v56 = vmul.f32 %v815_v54, %v1696_v9 }
 0x10a   : > { %v507_v22 = vmul.f32 %v815_v54, %v1697_v60  ;;  %v588_v28 = vadd.f32 %v1303_v62, %v544_v1  ;;  %v504_v4 = vmul.f32 %v817_v55, %v1698_v17  ;;  %v505_v12 = vmul.f32 %v817_v55, %v1699_v52  ;;  %v819_v45 = vpop.eup %818 }
 0x10b   : > { %v589_v29 = vadd.f32 %v1305_v63, %v545_v50  ;;  %622 = vst [vmem:[%s1445_s8 + $0x30] sm:$0xff] %v590_v8  ;;  %623 = vst [vmem:[%s1445_s8 + $0x38] sm:$0xff] %v591_v46  ;;  %v550_v44 = vmul.f32 %v1295_v58, %v506_v56  ;;  %824 = vrsqrt.f32 %v472_v0  ;;  %v427_v61 = vmax.f32 %v411_v53, 0.0  ;;  %v821_v10 = vpop.eup %820  ;;  %v348_v56 = vpop.xlane.xlu0 %347 }
 0x10c   : > { %v551_v13 = vmul.f32 %v1297_v59, %v507_v22  ;;  %620 = vst [vmem:[%s1445_s8 + $0x20] sm:$0xff] %v588_v28  ;;  %v548_v14 = vmul.f32 %v1295_v58, %v504_v4  ;;  %v549_v33 = vmul.f32 %v1297_v59, %v505_v12  ;;  %v410_v15 = vsub.f32 %v378_v11, %v1394_v47 }
 0x10d   : > { %621 = vst [vmem:[%s1445_s8 + $0x28] sm:$0xff] %v589_v29  ;;  %v381_v41 = vmul.f32 0.00390625, %v345_v2  ;;  %v594_v3 = vadd.f32 %v1303_v62, %v550_v44  ;;  %v1700_v38 = vsub.f32 %v1126_v18, %v1323_v51  ;;  %v1701_v37 = vsub.f32 %v1129_v19, %v1323_v51 }
 0x10e   : > { %v595_v43 = vadd.f32 %v1305_v63, %v551_v13  ;;  %v592_v5 = vadd.f32 %v1303_v62, %v548_v14  ;;  %v593_v47 = vadd.f32 %v1305_v63, %v549_v33  ;;  %v1702_v6 = vsub.f32 %v1132_v20, %v1337_v48 }
 0x10f   : > { %v510_v42 = vmul.f32 %v819_v45, %v1700_v38  ;;  %v511_v57 = vmul.f32 %v819_v45, %v1701_v37  ;;  %v1703_v54 = vsub.f32 %v1135_v21, %v1337_v48  ;;  %626 = vst [vmem:[%s1445_s8 + $0x50] sm:$0xff] %v594_v3  ;;  %v475_v19 = vadd.f32 1e-05, %v427_v61  ;;  %v351_v48 = vpop.xlane.xlu1 %350  ;;  %v823_v55 = vpop.eup %822 }
 0x110   : > { %v508_v0 = vmul.f32 %v821_v10, %v1702_v6  ;;  %627 = vst [vmem:[%s1445_s8 + $0x58] sm:$0xff] %v595_v43  ;;  %v426_v51 = vmax.f32 %v410_v15, 0.0  ;;  %624 = vst [vmem:[%s1445_s8 + $0x40] sm:$0xff] %v592_v5  ;;  %v413_v11 = vsub.f32 %v381_v41, %v1398_v7  ;;  %v380_v21 = vmul.f32 0.00390625, %v342_v35 }
 0x111   : > { %v509_v1 = vmul.f32 %v821_v10, %v1703_v54  ;;  %v554_v18 = vmul.f32 %v1295_v58, %v510_v42  ;;  %v555_v50 = vmul.f32 %v1297_v59, %v511_v57  ;;  %625 = vst [vmem:[%s1445_s8 + $0x48] sm:$0xff] %v593_v47  ;;  %826 = vrsqrt.f32 %v475_v19 }
 0x112   : > { %v552_v53 = vmul.f32 %v1295_v58, %v508_v0  ;;  %v474_v9 = vadd.f32 1e-05, %v426_v51  ;;  %v1704_v2 = vsub.f32 %v1142_v24, %v1349_v23  ;;  %v1705_v28 = vsub.f32 %v1145_v25, %v1349_v23  ;;  %v1707_v0 = vld [vmem:[#allocation8_spill] sm:$0xff]  ;;  %v1708_v51 = vld [vmem:[#allocation17_spill] sm:$0xff] }
 0x113   : > { %v553_v20 = vmul.f32 %v1297_v59, %v509_v1  ;;  %v598_v8 = vadd.f32 %v1303_v62, %v554_v18  ;;  %v599_v46 = vadd.f32 %v1305_v63, %v555_v50  ;;  %v429_v17 = vmax.f32 %v413_v11, 0.0 }
 0x114   : > { %v596_v60 = vadd.f32 %v1303_v62, %v552_v53  ;;  %v514_v7 = vmul.f32 %v823_v55, %v1704_v2  ;;  %v515_v29 = vmul.f32 %v823_v55, %v1705_v28  ;;  %828 = vrsqrt.f32 %v474_v9  ;;  %v1709_v53 = vld [vmem:[#allocation9_spill] sm:$0xff]  ;;  %v1712_v9 = vld [vmem:[#allocation11_spill] sm:$0xff] }
 0x115   : > { %v597_v22 = vadd.f32 %v1305_v63, %v553_v20  ;;  %630 = vst [vmem:[%s1445_s8 + $0x70] sm:$0xff] %v598_v8  ;;  %631 = vst [vmem:[%s1445_s8 + $0x78] sm:$0xff] %v599_v46  ;;  %v412_v4 = vsub.f32 %v380_v21, %v1402_v49  ;;  %v383_v52 = vmul.f32 0.00390625, %v351_v48  ;;  %v449_v12 = vsub.f32 %v1151_v27, %v1357_v16  ;;  %v825_v23 = vpop.eup %824  ;;  %v1710_v20 = vld [vmem:[#allocation10_spill] sm:$0xff] }
 0x116   : > { %628 = vst [vmem:[%s1445_s8 + $0x60] sm:$0xff] %v596_v60  ;;  %v558_v44 = vmul.f32 %v1295_v58, %v514_v7  ;;  %v559_v24 = vmul.f32 %v1297_v59, %v515_v29  ;;  %v382_v25 = vmul.f32 0.00390625, %v348_v56  ;;  %v477_v13 = vadd.f32 1e-05, %v429_v17  ;;  %v1711_v46 = vld [vmem:[#allocation18_spill] sm:$0xff]  ;;  %v1713_v60 = vld [vmem:[#allocation12_spill] sm:$0xff] }
 0x117   : > { %629 = vst [vmem:[%s1445_s8 + $0x68] sm:$0xff] %v597_v22  ;;  %v428_v61 = vmax.f32 %v412_v4, 0.0  ;;  %v415_v35 = vsub.f32 %v383_v52, %v1409_v40  ;;  %v398_v49 = vmul.f32 %v1405_v39, %v1405_v39  ;;  %v1706_v14 = vsub.f32 %v1148_v26, %v1357_v16 }
 0x118   : > { %v602_v45 = vadd.f32 %v1303_v62, %v558_v44  ;;  %v603_v27 = vadd.f32 %v1305_v63, %v559_v24  ;;  %v513_v15 = vmul.f32 %v825_v23, %v449_v12  ;;  %830 = vrsqrt.f32 %v477_v13 }
 0x119   : > { %v512_v33 = vmul.f32 %v825_v23, %v1706_v14  ;;  %v476_v41 = vadd.f32 1e-05, %v428_v61  ;;  %v431_v10 = vmax.f32 %v415_v35, 0.0  ;;  %v414_v3 = vsub.f32 %v382_v25, %v398_v49  ;;  %v1714_v25 = vld [vmem:[#allocation19_spill] sm:$0xff]  ;;  %v1715_v23 = vld [vmem:[#allocation13_spill] sm:$0xff]  ;;  %v1716_v61 = vld [vmem:[#allocation14_spill] sm:$0xff] }
 0x11a   : > { %634 = vst [vmem:[%s1445_s8 + $0x90] sm:$0xff] %v602_v45  ;;  %635 = vst [vmem:[%s1445_s8 + $0x98] sm:$0xff] %v603_v27  ;;  %v557_v43 = vmul.f32 %v1297_v59, %v513_v15  ;;  %v454_v26 = vsub.f32 %v1158_v30, %v1372_v34  ;;  %v455_v16 = vsub.f32 %v1161_v31, %v1372_v34  ;;  %v1717_v49 = vld [vmem:[#allocation15_spill] sm:$0xff]  ;;  %v1718_v27 = vld [vmem:[#allocation16_spill] sm:$0xff] }
 0x11b   : > { %v556_v40 = vmul.f32 %v1295_v58, %v512_v33  ;;  %832 = vrsqrt.f32 %v476_v41  ;;  %v479_v38 = vadd.f32 1e-05, %v431_v10  ;;  %v430_v42 = vmax.f32 %v414_v3, 0.0  ;;  %v827_v5 = vpop.eup %826 }
 0x11c   : > { %v601_v57 = vadd.f32 %v1305_v63, %v557_v43  ;;  %v452_v6 = vsub.f32 %v1164_v32, %v1375_v36  ;;  %v453_v54 = vsub.f32 %v1707_v0, %v1375_v36  ;;  %v518_v1 = vmul.f32 %v827_v5, %v454_v26 }
 0x11d   : > { %v600_v37 = vadd.f32 %v1303_v62, %v556_v40  ;;  %834 = vrsqrt.f32 %v479_v38  ;;  %v478_v47 = vadd.f32 1e-05, %v430_v42  ;;  %v519_v30 = vmul.f32 %v827_v5, %v455_v16 }
 0x11e   : > { %633 = vst [vmem:[%s1445_s8 + $0x88] sm:$0xff] %v601_v57  ;;  %v829_v18 = vpop.eup %828  ;;  %v562_v31 = vmul.f32 %v1295_v58, %v518_v1  ;;  %v458_v32 = vsub.f32 %v1709_v53, %v1708_v51  ;;  %v459_v36 = vsub.f32 %v1710_v20, %v1708_v51  ;;  %v456_v56 = vsub.f32 %v1712_v9, %v1711_v46 }
 0x11f   : > { %632 = vst [vmem:[%s1445_s8 + $0x80] sm:$0xff] %v600_v37  ;;  %836 = vrsqrt.f32 %v478_v47  ;;  %v563_v34 = vmul.f32 %v1297_v59, %v519_v30  ;;  %v516_v50 = vmul.f32 %v829_v18, %v452_v6  ;;  %v517_v19 = vmul.f32 %v829_v18, %v453_v54 }
 0x120   : > { %v606_v11 = vadd.f32 %v1303_v62, %v562_v31  ;;  %v457_v22 = vsub.f32 %v1713_v60, %v1711_v46  ;;  %v462_v13 = vsub.f32 %v1715_v23, %v1714_v25  ;;  %v463_v35 = vsub.f32 %v1716_v61, %v1714_v25 }
 0x121   : > { %v607_v21 = vadd.f32 %v1305_v63, %v563_v34  ;;  %v560_v48 = vmul.f32 %v1295_v58, %v516_v50  ;;  %v561_v55 = vmul.f32 %v1297_v59, %v517_v19  ;;  %v460_v45 = vsub.f32 %v1717_v49, %v1405_v39 }
 0x122   : > { %v831_v8 = vpop.eup %830  ;;  %638 = vst [vmem:[%s1445_s8 + $0xb0] sm:$0xff] %v606_v11  ;;  %v461_v14 = vsub.f32 %v1718_v27, %v1405_v39 }
 0x123   : > { %639 = vst [vmem:[%s1445_s8 + $0xb8] sm:$0xff] %v607_v21  ;;  %v604_v2 = vadd.f32 %v1303_v62, %v560_v48  ;;  %v605_v7 = vadd.f32 %v1305_v63, %v561_v55  ;;  %v522_v28 = vmul.f32 %v831_v8, %v458_v32  ;;  %v523_v29 = vmul.f32 %v831_v8, %v459_v36 }
 0x125   : > { %v833_v17 = vpop.eup %832  ;;  %636 = vst [vmem:[%s1445_s8 + $0xa0] sm:$0xff] %v604_v2  ;;  %637 = vst [vmem:[%s1445_s8 + $0xa8] sm:$0xff] %v605_v7  ;;  %v566_v4 = vmul.f32 %v1295_v58, %v522_v28  ;;  %v567_v52 = vmul.f32 %v1297_v59, %v523_v29 }
 0x126   : > { %v520_v12 = vmul.f32 %v833_v17, %v456_v56  ;;  %v521_v44 = vmul.f32 %v833_v17, %v457_v22 }
 0x127   : > { %v835_v24 = vpop.eup %834  ;;  %v610_v33 = vadd.f32 %v1303_v62, %v566_v4  ;;  %v611_v15 = vadd.f32 %v1305_v63, %v567_v52 }
 0x128   : > { %v564_v41 = vmul.f32 %v1295_v58, %v520_v12  ;;  %v565_v10 = vmul.f32 %v1297_v59, %v521_v44  ;;  %v526_v40 = vmul.f32 %v835_v24, %v462_v13  ;;  %v527_v43 = vmul.f32 %v835_v24, %v463_v35 }
 0x129   : > { %v837_v3 = vpop.eup %836  ;;  %642 = vst [vmem:[%s1445_s8 + $0xd0] sm:$0xff] %v610_v33  ;;  %643 = vst [vmem:[%s1445_s8 + $0xd8] sm:$0xff] %v611_v15 }
 0x12a   : > { %v608_v38 = vadd.f32 %v1303_v62, %v564_v41  ;;  %v609_v42 = vadd.f32 %v1305_v63, %v565_v10  ;;  %v524_v39 = vmul.f32 %v837_v3, %v460_v45  ;;  %v525_v26 = vmul.f32 %v837_v3, %v461_v14 }
 0x12b   : > { %v570_v16 = vmul.f32 %v1295_v58, %v526_v40  ;;  %v571_v37 = vmul.f32 %v1297_v59, %v527_v43 }
 0x12c   : > { %640 = vst [vmem:[%s1445_s8 + $0xc0] sm:$0xff] %v608_v38  ;;  %641 = vst [vmem:[%s1445_s8 + $0xc8] sm:$0xff] %v609_v42  ;;  %v568_v57 = vmul.f32 %v1295_v58, %v524_v39  ;;  %v569_v5 = vmul.f32 %v1297_v59, %v525_v26 }
 0x12d   : > { %v614_v47 = vadd.f32 %v1303_v62, %v570_v16  ;;  %v615_v6 = vadd.f32 %v1305_v63, %v571_v37 }
 0x12e   : > { %v612_v0 = vadd.f32 %v1303_v62, %v568_v57  ;;  %v613_v58 = vadd.f32 %v1305_v63, %v569_v5 }
 0x12f   : > { %646 = vst [vmem:[%s1445_s8 + $0xf0] sm:$0xff] %v614_v47  ;;  %647 = vst [vmem:[%s1445_s8 + $0xf8] sm:$0xff] %v615_v6 }
 0x130   : > { %644 = vst [vmem:[%s1445_s8 + $0xe0] sm:$0xff] %v612_v0  ;;  %645 = vst [vmem:[%s1445_s8 + $0xe8] sm:$0xff] %v613_v58 }
 0x131   : > { %881 = shalt.err (!%p878_p1)
}
 0x132   : > { %s882_s9 = scalar_lea.hbm %s1600_s22, 4096  ;;  %s886_s23 = scalar_lea.hbm %s1654_s3, 32768 }
 0x133   : > { %p883_p3 = scmp.ne.s32.totalorder %s1600_s22, %s882_s9  ;;  %p887_p0 = scmp.lt.u32.totalorder %s1600_s22, %s1654_s3 }
 0x134   : > { %p888_p2 = scmp.lt.u32.totalorder %s886_s23, %s882_s9  ;;  %p890_p6 = scmp.lt.u32.totalorder %s882_s9, %s1600_s22 }
 0x135   : > { %p884_p4 = pnand %p883_p3, %p1719_p10 }
 0x136   : > { %p889_p7 = por %p888_p2, %p887_p0 }
 0x137   : > { %p885_p5 = pneg %p884_p4 }
 0x138   : > { %p891_p11 = por %p890_p6, %p889_p7 }
 0x13a   : > { %p892_p12 = pnand %p891_p11, %p885_p5 }
 0x13c   : > { %895 = shalt.err (!%p892_p12)
}
 0x13d   : > { %s940_s7 = smov 256   ;;  %s941_s8 = smov 16  }
 0x13e   : > { %758 = dma.vmem_to_hbm [thread:$0]  (%p1719_p10), %s1602_s19, 4096, %s1600_s22, %s649_s26, %s940_s7, %s940_s7, %s941_s8  }
 0x13f PF: > { %p769_p8 = scmp.ge.s32.totalorder %s934_s15, 2  ;;  %s678_s17 = sand.u32 1, %s922_s12  }
 0x140   : > { %p1720_p9 = scmp.ne.s32.totalorder %s1674_s25, 0  ;;  %s679_s16 = scalar_lea.sflag [#allocation4], %s678_s17 }
 0x142   : > { %p765_p13 = pnand %p769_p8, %p1720_p9 }
 0x144   : > { %917 = dma.done.wait (!%p765_p13), %s679_s16, 4096  }
 0x145   : > { %919 = vsyncadd (!%p765_p13), %s679_s16, 4294963200  ;;  %p16_p1 = scmp.ge.s32.totalorder %s987_s18, 10   ;;  %s1721_s12 = smov %s926_s13 }
 0x146   : > { %s1722_s13 = smov %s930_s14  ;;  %s1723_s14 = smov %s999_s21 }
 0x147   : > { %s1724_s15 = smov %s987_s18  ;;  %18 = sbr.rel (!%p16_p1) target bundleno = 5 (0x5), region = 77 }
 0x14e   :  { %684 = vsyncpa [#allocation3], 1 }
 0x14f   :  { %686 = vsyncpa [#allocation3 + $0x1], 1 }
 0x150   :  { %687 = vsyncpa [#allocation4], 1 }
 0x151   :  { %689 = vsyncpa [#allocation4 + $0x1], 1 }

</bundles_post_ra>
